<compile_context>
chip_gen: v6e
topology: v6e:2x2x1
jax: 0.10.0
libtpu: 0.0.40
codegen_flags: <defaults>
</compile_context>

<pallas_src>
import jax
import jax.numpy as jnp
from jax.experimental import pallas as pl
from jax.experimental.pallas import tpu as pltpu

LN_EPS = 1e-5
LEAKY_SLOPE = 0.01  # nn.LeakyReLU default negative_slope


def skeleton_gat_kernel(x_ref, gamma_ref, beta_ref, wqkv_ref, bqkv_ref, o_ref):
    # Block shapes are static: x_ref is (Bt, J, D).
    bt, J, D = x_ref.shape

    x = x_ref[...].astype(jnp.float32)                 # (Bt, J, D)
    x2 = x.reshape(bt * J, D)                          # merge leading dims

    # ---- LayerNorm over feature dim ----
    mu = jnp.mean(x2, axis=-1, keepdims=True)
    var = jnp.mean((x2 - mu) * (x2 - mu), axis=-1, keepdims=True)
    xn = (x2 - mu) * jax.lax.rsqrt(var + LN_EPS)
    xn = xn * gamma_ref[...] + beta_ref[...]           # gamma/beta: (1, D)

    # ---- fused Q/K/V projection: one (Bt*J, D) @ (D, 3D) matmul ----
    qkv = jnp.dot(xn, wqkv_ref[...], preferred_element_type=jnp.float32)
    qkv = qkv + bqkv_ref[...]                          # (Bt*J, 3D)
    qkv = qkv.reshape(bt, J, 3 * D)
    q = qkv[..., :D]
    k = qkv[..., D:2 * D]
    v = qkv[..., 2 * D:]

    # ---- attention over joints: softmax(Q K^T) V (batched over Bt) ----
    s = jnp.einsum("bqd,bkd->bqk", q, k,
                   preferred_element_type=jnp.float32)  # (Bt, J, J)
    s = s - jnp.max(s, axis=-1, keepdims=True)
    p = jnp.exp(s)
    w = p / jnp.sum(p, axis=-1, keepdims=True)          # exact softmax
    att = jnp.einsum("bqk,bkd->bqd", w, v,
                     preferred_element_type=jnp.float32)  # (Bt, J, D)

    # ---- LeakyReLU ----
    act = jnp.where(att >= 0, att, LEAKY_SLOPE * att)

    # Dropout: eval-mode identity (deterministic inference kernel).
    # ---- residual ----
    o_ref[...] = (act + x).astype(o_ref.dtype)


def _pick_batch_block(B, max_block=512):
    """Batch tile per grid step.

    * B <= 8: one grid step carrying the whole batch (fixed-overhead regime).
    * Larger B: biggest divisor of B that is <= max_block; prefer divisors
      that leave an even grid count so v7x's two TensorCores split evenly.
    """
    if B <= 8:
        return B
    limit = min(B, max_block)
    divisors = [d for d in range(1, limit + 1) if B % d == 0]
    even_grid = [d for d in divisors if (B // d) % 2 == 0]
    pool = even_grid if even_grid else divisors
    return max(pool)


def prepare_params(params):
    """One-time fusion of the module parameters for the kernel.

    PyTorch nn.Linear: y = x @ W.T + b with W of shape (out, in).
    Pre-transpose to (in, out) and fuse Q|K|V into one (D, 3D) weight so the
    per-forward wrapper does no transposes/concats.
    """
    D = params["wq"].shape[0]
    wqkv = jnp.concatenate(
        [params["wq"].T, params["wk"].T, params["wv"].T], axis=1)      # (D, 3D)
    bqkv = jnp.concatenate(
        [params["bq"], params["bk"], params["bv"]]).reshape(1, 3 * D)  # (1, 3D)
    return {
        "gamma": params["ln_gamma"].reshape(1, D),
        "beta": params["ln_beta"].reshape(1, D),
        "wqkv": wqkv,
        "bqkv": bqkv,
    }


def skeleton_gat(x, fused, *, batch_block=None):
    """x: (B, J, D) float32. fused: output of prepare_params()."""
    B, J, D = x.shape

    if batch_block is None:
        batch_block = _pick_batch_block(B)
    assert B % batch_block == 0, "batch_block must divide B"
    grid_b = B // batch_block

    full2d = lambda b: (0, 0)

    return pl.pallas_call(
        skeleton_gat_kernel,
        out_shape=jax.ShapeDtypeStruct((B, J, D), x.dtype),
        grid_spec=pltpu.PrefetchScalarGridSpec(
            num_scalar_prefetch=0,
            grid=(grid_b,),
            in_specs=[
                pl.BlockSpec((batch_block, J, D), lambda b: (b, 0, 0)),  # x
                pl.BlockSpec((1, D), full2d),          # ln gamma
                pl.BlockSpec((1, D), full2d),          # ln beta
                pl.BlockSpec((D, 3 * D), full2d),      # fused W_qkv
                pl.BlockSpec((1, 3 * D), full2d),      # fused b_qkv
            ],
            out_specs=pl.BlockSpec((batch_block, J, D), lambda b: (b, 0, 0)),
        ),
        compiler_params=pltpu.CompilerParams(
            dimension_semantics=("parallel",)),
    )(x, fused["gamma"], fused["beta"], fused["wqkv"], fused["bqkv"])


def reference_forward(x, params):
    """Pure-JAX reference mirroring the PyTorch forward (eval mode, f32)."""
    mu = jnp.mean(x, axis=-1, keepdims=True)
    var = jnp.mean((x - mu) ** 2, axis=-1, keepdims=True)
    xn = (x - mu) / jnp.sqrt(var + LN_EPS)
    xn = xn * params["ln_gamma"] + params["ln_beta"]
    q = xn @ params["wq"].T + params["bq"]
    k = xn @ params["wk"].T + params["bk"]
    v = xn @ params["wv"].T + params["bv"]
    s = jnp.einsum("bqd,bkd->bqk", q, k)
    w = jax.nn.softmax(s, axis=-1)
    att = jnp.einsum("bqk,bkd->bqd", w, v)
    act = jnp.where(att >= 0, att, LEAKY_SLOPE * att)
    return act + x


def init_params(key, input_dim):
    ks = jax.random.split(key, 6)
    bound = 1.0 / jnp.sqrt(input_dim)
    u = lambda k, shape: jax.random.uniform(k, shape, jnp.float32, -bound, bound)
    return {
        "ln_gamma": jnp.ones((input_dim,), jnp.float32),
        "ln_beta": jnp.zeros((input_dim,), jnp.float32),
        "wq": u(ks[0], (input_dim, input_dim)), "bq": u(ks[1], (input_dim,)),
        "wk": u(ks[2], (input_dim, input_dim)), "bk": u(ks[3], (input_dim,)),
        "wv": u(ks[4], (input_dim, input_dim)), "bv": u(ks[5], (input_dim,)),
    }


if __name__ == "__main__":
    key = jax.random.PRNGKey(0)
    kx, kp = jax.random.split(key)

    B, J, D = 2, 16, 32           # batch, joint_count, input_dim
    x = jax.random.normal(kx, (B, J, D), jnp.float32)
    params = init_params(kp, D)

    # Fuse weights once (hoisted out of the per-call path).
    fused = prepare_params(params)
    fused = jax.tree_util.tree_map(jax.block_until_ready, fused)

    out = skeleton_gat(x, fused)
    out = jax.block_until_ready(out)

    ref = reference_forward(x, params)
    assert out.shape == (B, J, D)
    # Exact softmax denominator now; remaining divergence is ULP-level
    # (rsqrt-vs-sqrt LayerNorm, f32 matmul accumulation order).
    assert jnp.allclose(out, ref, atol=1e-4, rtol=1e-4), "mismatch vs reference"

    print("KERNEL_OK")
</pallas_src>

<mosaic_0001>
module attributes {stable_mosaic.version = 11 : i64} {
  func.func @skeleton_gat_kernel(%arg0: i32, %arg1: memref<2x16x32xf32, #tpu.memory_space<vmem>>, %arg2: memref<1x32xf32, #tpu.memory_space<vmem>>, %arg3: memref<1x32xf32, #tpu.memory_space<vmem>>, %arg4: memref<32x96xf32, #tpu.memory_space<vmem>>, %arg5: memref<1x96xf32, #tpu.memory_space<vmem>>, %arg6: memref<2x16x32xf32, #tpu.memory_space<vmem>>) attributes {dimension_semantics = [#tpu.dimension_semantics<parallel>], iteration_bounds = array<i64: 1>, scalar_prefetch = 0 : i64, scratch_operands = 0 : i64, tpu.core_type = #tpu.core_type<tc>, window_params = [{transform_indices = @transform_0, window_bounds = array<i64: 2, 16, 32>}, {pipeline_mode = #tpu.pipeline_mode<synchronous>, transform_indices = @transform_1, window_bounds = array<i64: 1, 32>}, {pipeline_mode = #tpu.pipeline_mode<synchronous>, transform_indices = @transform_2, window_bounds = array<i64: 1, 32>}, {pipeline_mode = #tpu.pipeline_mode<synchronous>, transform_indices = @transform_3, window_bounds = array<i64: 32, 96>}, {pipeline_mode = #tpu.pipeline_mode<synchronous>, transform_indices = @transform_4, window_bounds = array<i64: 1, 96>}, {transform_indices = @transform_5, window_bounds = array<i64: 2, 16, 32>}]} {
    %c0 = arith.constant 0 : index
    %c0_0 = arith.constant 0 : index
    %c0_1 = arith.constant 0 : index
    %0 = vector.load %arg1[%c0, %c0_0, %c0_1] : memref<2x16x32xf32, #tpu.memory_space<vmem>>, vector<2x16x32xf32>
    %1 = vector.shape_cast %0 : vector<2x16x32xf32> to vector<32x32xf32>
    %cst = arith.constant dense<0.000000e+00> : vector<32xf32>
    %2 = vector.multi_reduction <add>, %1, %cst [1] : vector<32x32xf32> to vector<32xf32>
    %3 = vector.shape_cast %2 : vector<32xf32> to vector<32x1xf32>
    %cst_2 = arith.constant 3.200000e+01 : f32
    %4 = vector.broadcast %cst_2 : f32 to vector<32x1xf32>
    %5 = arith.divf %3, %4 : vector<32x1xf32>
    %6 = vector.broadcast %5 : vector<32x1xf32> to vector<32x32xf32>
    %7 = arith.subf %1, %6 : vector<32x32xf32>
    %8 = vector.broadcast %5 : vector<32x1xf32> to vector<32x32xf32>
    %9 = arith.subf %1, %8 : vector<32x32xf32>
    %10 = arith.mulf %7, %9 : vector<32x32xf32>
    %cst_3 = arith.constant dense<0.000000e+00> : vector<32xf32>
    %11 = vector.multi_reduction <add>, %10, %cst_3 [1] : vector<32x32xf32> to vector<32xf32>
    %12 = vector.shape_cast %11 : vector<32xf32> to vector<32x1xf32>
    %cst_4 = arith.constant 3.200000e+01 : f32
    %13 = vector.broadcast %cst_4 : f32 to vector<32x1xf32>
    %14 = arith.divf %12, %13 : vector<32x1xf32>
    %15 = vector.broadcast %5 : vector<32x1xf32> to vector<32x32xf32>
    %16 = arith.subf %1, %15 : vector<32x32xf32>
    %cst_5 = arith.constant 9.99999974E-6 : f32
    %17 = vector.broadcast %cst_5 : f32 to vector<32x1xf32>
    %18 = arith.addf %14, %17 : vector<32x1xf32>
    %19 = math.rsqrt %18 : vector<32x1xf32>
    %20 = vector.broadcast %19 : vector<32x1xf32> to vector<32x32xf32>
    %21 = arith.mulf %16, %20 : vector<32x32xf32>
    %c0_6 = arith.constant 0 : index
    %c0_7 = arith.constant 0 : index
    %22 = vector.load %arg2[%c0_6, %c0_7] : memref<1x32xf32, #tpu.memory_space<vmem>>, vector<1x32xf32>
    %23 = vector.broadcast %22 : vector<1x32xf32> to vector<32x32xf32>
    %24 = arith.mulf %21, %23 : vector<32x32xf32>
    %c0_8 = arith.constant 0 : index
    %c0_9 = arith.constant 0 : index
    %25 = vector.load %arg3[%c0_8, %c0_9] : memref<1x32xf32, #tpu.memory_space<vmem>>, vector<1x32xf32>
    %26 = vector.broadcast %25 : vector<1x32xf32> to vector<32x32xf32>
    %27 = arith.addf %24, %26 : vector<32x32xf32>
    %c0_10 = arith.constant 0 : index
    %c0_11 = arith.constant 0 : index
    %28 = vector.load %arg4[%c0_10, %c0_11] : memref<32x96xf32, #tpu.memory_space<vmem>>, vector<32x96xf32>
    %cst_12 = arith.constant dense<0.000000e+00> : vector<32x96xf32>
    %29 = tpu.matmul %27, %28, %cst_12 {dimension_numbers = #tpu.dot_dimension_numbers<[1], [0], [0], [1], [0, 0, 1, 1], [], []>} : vector<32x32xf32>, vector<32x96xf32>, vector<32x96xf32> -> vector<32x96xf32>
    %c0_13 = arith.constant 0 : index
    %c0_14 = arith.constant 0 : index
    %30 = vector.load %arg5[%c0_13, %c0_14] : memref<1x96xf32, #tpu.memory_space<vmem>>, vector<1x96xf32>
    %31 = vector.broadcast %30 : vector<1x96xf32> to vector<32x96xf32>
    %32 = arith.addf %29, %31 : vector<32x96xf32>
    %33 = vector.shape_cast %32 : vector<32x96xf32> to vector<2x16x96xf32>
    %34 = vector.extract_strided_slice %33 {offsets = [0, 0, 0], sizes = [2, 16, 32], strides = [1, 1, 1]} : vector<2x16x96xf32> to vector<2x16x32xf32>
    %35 = vector.extract_strided_slice %33 {offsets = [0, 0, 32], sizes = [2, 16, 32], strides = [1, 1, 1]} : vector<2x16x96xf32> to vector<2x16x32xf32>
    %36 = vector.extract_strided_slice %33 {offsets = [0, 0, 64], sizes = [2, 16, 32], strides = [1, 1, 1]} : vector<2x16x96xf32> to vector<2x16x32xf32>
    "tpu.trace_start"() <{level = 10 : i32, message = "bqd,bkd->bqk"}> : () -> ()
    %cst_15 = arith.constant dense<0.000000e+00> : vector<2x16x16xf32>
    %37 = tpu.matmul %34, %35, %cst_15 {dimension_numbers = #tpu.dot_dimension_numbers<[2], [2], [1], [1], [0, 0, 0, 1, 1, 1], [0], [0]>} : vector<2x16x32xf32>, vector<2x16x32xf32>, vector<2x16x16xf32> -> vector<2x16x16xf32>
    "tpu.trace_stop"() : () -> ()
    %cst_16 = arith.constant dense<0xFF800000> : vector<2x16xf32>
    %38 = vector.multi_reduction <maximumf>, %37, %cst_16 [2] : vector<2x16x16xf32> to vector<2x16xf32>
    %39 = vector.shape_cast %38 : vector<2x16xf32> to vector<2x16x1xf32>
    %40 = vector.broadcast %39 : vector<2x16x1xf32> to vector<2x16x16xf32>
    %41 = arith.subf %37, %40 : vector<2x16x16xf32>
    %42 = math.exp %41 : vector<2x16x16xf32>
    %cst_17 = arith.constant dense<0.000000e+00> : vector<2x16xf32>
    %43 = vector.multi_reduction <add>, %42, %cst_17 [2] : vector<2x16x16xf32> to vector<2x16xf32>
    %44 = vector.shape_cast %43 : vector<2x16xf32> to vector<2x16x1xf32>
    %45 = vector.broadcast %44 : vector<2x16x1xf32> to vector<2x16x16xf32>
    %46 = arith.divf %42, %45 : vector<2x16x16xf32>
    "tpu.trace_start"() <{level = 10 : i32, message = "bqk,bkd->bqd"}> : () -> ()
    %cst_18 = arith.constant dense<0.000000e+00> : vector<2x16x32xf32>
    %47 = tpu.matmul %46, %36, %cst_18 {dimension_numbers = #tpu.dot_dimension_numbers<[2], [1], [1], [2], [0, 0, 0, 1, 1, 2], [0], [0]>} : vector<2x16x16xf32>, vector<2x16x32xf32>, vector<2x16x32xf32> -> vector<2x16x32xf32>
    %cst_19 = arith.constant 0.000000e+00 : f32
    "tpu.trace_stop"() : () -> ()
    %48 = vector.broadcast %cst_19 : f32 to vector<2x16x32xf32>
    %49 = arith.cmpf oge, %47, %48 : vector<2x16x32xf32>
    %cst_20 = arith.constant 0.00999999977 : f32
    %50 = vector.broadcast %cst_20 : f32 to vector<2x16x32xf32>
    %51 = arith.mulf %50, %47 : vector<2x16x32xf32>
    %52 = arith.select %49, %47, %51 : vector<2x16x32xi1>, vector<2x16x32xf32>
    %53 = arith.addf %52, %0 : vector<2x16x32xf32>
    %c0_21 = arith.constant 0 : index
    %c0_22 = arith.constant 0 : index
    %c0_23 = arith.constant 0 : index
    %54 = vector.load %arg6[%c0_21, %c0_22, %c0_23] : memref<2x16x32xf32, #tpu.memory_space<vmem>>, vector<2x16x32xf32>
    tpu.vector_store %arg6[%c0_21, %c0_22, %c0_23], %53 {strides = array<i32>} : memref<2x16x32xf32, #tpu.memory_space<vmem>>, vector<2x16x32xf32>,
    return
  }
  func.func @transform_0(%arg0: i32) -> (i32, i32, i32) {
    %c0_i32 = arith.constant 0 : i32
    %c0_i32_0 = arith.constant 0 : i32
    %c0_i32_1 = arith.constant 0 : i32
    return %arg0, %c0_i32, %c0_i32_0 : i32, i32, i32
  }
  func.func @transform_1(%arg0: i32) -> (i32, i32) {
    %c0_i32 = arith.constant 0 : i32
    %c0_i32_0 = arith.constant 0 : i32
    %c0_i32_1 = arith.constant 0 : i32
    return %c0_i32, %c0_i32_0 : i32, i32
  }
  func.func @transform_2(%arg0: i32) -> (i32, i32) {
    %c0_i32 = arith.constant 0 : i32
    %c0_i32_0 = arith.constant 0 : i32
    %c0_i32_1 = arith.constant 0 : i32
    return %c0_i32, %c0_i32_0 : i32, i32
  }
  func.func @transform_3(%arg0: i32) -> (i32, i32) {
    %c0_i32 = arith.constant 0 : i32
    %c0_i32_0 = arith.constant 0 : i32
    %c0_i32_1 = arith.constant 0 : i32
    return %c0_i32, %c0_i32_0 : i32, i32
  }
  func.func @transform_4(%arg0: i32) -> (i32, i32) {
    %c0_i32 = arith.constant 0 : i32
    %c0_i32_0 = arith.constant 0 : i32
    %c0_i32_1 = arith.constant 0 : i32
    return %c0_i32, %c0_i32_0 : i32, i32
  }
  func.func @transform_5(%arg0: i32) -> (i32, i32, i32) {
    %c0_i32 = arith.constant 0 : i32
    %c0_i32_0 = arith.constant 0 : i32
    %c0_i32_1 = arith.constant 0 : i32
    return %arg0, %c0_i32, %c0_i32_0 : i32, i32, i32
  }
}

</mosaic_0001>

<bundles_post_ra>
// kernel: tpu_custom_call.1
= control target key start
LH: loop header
LB: loop body
LE: loop exit
PB: predicated region body
PF: predicated region fallthrough
CT: control target
= control target key end

     0   :  { %10 = vsyncpa [#allocation3], 0  ;;  %s988_s0 = inlined_call_operand.hbm [shape: f32[2,16,32], index: 0, kind: input, shape index: {}]   ;;  %s989_s1 = inlined_call_operand.vmem [shape: f32[1,32], index: 1, kind: input, shape index: {}]   ;;  %s990_s2 = inlined_call_operand.vmem [shape: f32[1,32], index: 2, kind: input, shape index: {}]   ;;  %s991_s3 = inlined_call_operand.hbm [shape: f32[32,96], index: 3, kind: input, shape index: {}]   ;;  %s992_s4 = inlined_call_operand.vmem [shape: f32[1,96], index: 4, kind: input, shape index: {}]   ;;  %s993_s5 = inlined_call_operand.hbm [shape: f32[2,16,32], index: 5, kind: output, shape index: {}]  }
   0x1   :  { %11 = vsyncpa [#allocation6], 0 }
   0x2   :  { %12 = vsyncpa [#allocation4], 0  ;;  %s854_s18 = smov [#allocation2]  }
   0x3   :  { %s18_s19 = sshll.u32 %s854_s18, 4  ;;  %s19_s19 = int_to_ptr.vmem [resolvable:$true] %s18_s19 }
   0x4   :  { %s796_s20 = scalar_lea.vmem %s19_s19, 512  ;;  %p801_p1 = scmp.lt.s32.totalorder %s19_s19, %s19_s19 }
   0x5   :  { %p797_p0 = scmp.ne.s32.totalorder %s19_s19, %s796_s20  ;;  %p802_p2 = scmp.lt.s32.totalorder %s796_s20, %s796_s20 }
   0x7   :  { %p803_p3 = por %p802_p2, %p801_p1 }
   0x9   :  { %p804_p4 = pnand %p803_p3, %p797_p0 }
   0xb   :  { %807 = shalt.err (!%p804_p4)
}
   0xc   :  { %s855_s21 = smov 128   ;;  %s856_s22 = smov 8  }
   0xd   :  { %24 = dma.hbm_to_vmem [thread:$0]  %s988_s0, 512, %s19_s19, [#allocation3], %s855_s21, %s855_s21, %s856_s22  }
   0xe   :  { %s857_s25 = smov [#allocation5]  }
   0xf   :  { %s34_s26 = sshll.u32 %s857_s25, 4  ;;  %s35_s26 = int_to_ptr.vmem [resolvable:$true] %s34_s26 }
  0x10   :  { %s816_s27 = scalar_lea.vmem %s35_s26, 512  ;;  %p821_p6 = scmp.lt.s32.totalorder %s35_s26, %s35_s26 }
  0x11   :  { %p817_p5 = scmp.ne.s32.totalorder %s35_s26, %s816_s27  ;;  %p822_p7 = scmp.lt.s32.totalorder %s816_s27, %s816_s27 }
  0x13   :  { %p823_p8 = por %p822_p7, %p821_p6 }
  0x15   :  { %p824_p9 = pnand %p823_p8, %p817_p5 }
  0x17   :  { %827 = shalt.err (!%p824_p9)
}
  0x18   :  { %40 = dma.hbm_to_vmem [thread:$0]  %s991_s3, 512, %s35_s26, [#allocation6], %s855_s21, %s855_s21, %s856_s22  }
  0x19   :  { %848 = dma.done.wait [#allocation3], 512  }
  0x1a   :  { %849 = vsyncadd [#allocation3], 4294966784 }
  0x1b   :  { %850 = dma.done.wait [#allocation6], 512  }
  0x1c   :  { %851 = vsyncadd [#allocation6], 4294966784  ;;  %vm53_vm0 = vcmask 261120   ;;  %v903_v0 = vld [vmem:[#allocation2] sm:$0xff]  ;;  %v905_v1 = vld [vmem:[#allocation2 + $0x10] sm:$0xff]  ;;  %s858_s7 = smov 96  }
  0x1d   :  { %v907_v2 = vld [vmem:[#allocation2 + $0x8] sm:$0xff]  ;;  %v54_v3 = vsel %vm53_vm0, %v903_v0, 0.0  ;;  %v60_v4 = vsel %vm53_vm0, %v905_v1, 0.0  ;;  %v913_v5 = vld [vmem:[#allocation2 + $0x18] sm:$0xff]  ;;  %v131_v29 = vld [vmem:[#allocation5 + $0x10] sm:$0xff]  ;;  %vm415_vm1 = vcmask 130048  }
  0x1e   :  { %55 = vadd.xlane.f32.xlu0 %v54_v3  ;;  %61 = vadd.xlane.f32.xlu1 %v60_v4  ;;  %v57_v6 = vsel %vm53_vm0, %v907_v2, 0.0  ;;  %v63_v7 = vsel %vm53_vm0, %v913_v5, 0.0  ;;  %v132_v28 = vld [vmem:[#allocation5 + $0x18] sm:$0xff]  ;;  %v130_v30 = vld [vmem:[#allocation5 + $0x8] sm:$0xff]  ;;  %v129_v31 = vld [vmem:[#allocation5] sm:$0xff]  ;;  %s860_s8 = smov [#allocation7]  }
  0x1f   :  { %715 = vmatprep.subr.mxu0 %v132_v28  ;;  %v672_v45 = vld [vmem:[%s989_s1] ss:$0 sm:$0xff]  ;;  %s659_s9 = sshll.u32 %s860_s8, 4  ;;  %s660_s9 = int_to_ptr.vmem [resolvable:$true] %s659_s9 }
  0x20   :  { %716 = vmatpush3.msra.mxu0 %v132_v28  ;;  %v673_v47 = vld [vmem:[%s990_s2] ss:$0 sm:$0xff]  ;;  %s828_s10 = scalar_lea.vmem %s660_s9, 512  ;;  %p833_p11 = scmp.lt.s32.totalorder %s660_s9, %s660_s9 }
  0x21   :  { %717 = vmatprep.subr.mxu0 %v131_v29  ;;  %v674_v62 = vld [vmem:[%s992_s4] ss:$0 sm:$0xff]  ;;  %s859_s4 = smov 64   ;;  %p829_p10 = scmp.ne.s32.totalorder %s660_s9, %s828_s10 }
  0x22   :  { %58 = vadd.xlane.f32.xlu0 %v57_v6  ;;  %64 = vadd.xlane.f32.xlu1 %v63_v7  ;;  %p834_p12 = scmp.lt.s32.totalorder %s828_s10, %s828_s10 }
  0x23   :  { %718 = vmatpush3.msra.mxu0 %v131_v29 }
  0x24   :  { %719 = vmatprep.subr.mxu0 %v130_v30  ;;  %p835_p13 = por %p834_p12, %p833_p11 }
  0x25   :  { %720 = vmatpush3.msra.mxu0 %v130_v30 }
  0x26   :  { %721 = vmatprep.subr.mxu0 %v129_v31  ;;  %p836_p0 = pnand %p835_p13, %p829_p10 }
  0x27   :  { %722 = vmatpush3.msra.mxu0 %v129_v31 }
  0xa7   :  { %v56_v8 = vpop.xlane.xlu0 %55  ;;  %v62_v9 = vpop.xlane.xlu1 %61 }
  0xa8   :  { %v67_v10 = vmul.f32 0.03125, %v56_v8  ;;  %v69_v11 = vmul.f32 0.03125, %v62_v9 }
  0xaa   :  { %v71_v12 = vsub.f32 %v903_v0, %v67_v10  ;;  %v73_v13 = vsub.f32 %v905_v1, %v69_v11 }
  0xab   :  { %v59_v14 = vpop.xlane.xlu0 %58  ;;  %v65_v15 = vpop.xlane.xlu1 %64 }
  0xac   :  { %v68_v16 = vmul.f32 0.03125, %v59_v14  ;;  %v70_v17 = vmul.f32 0.03125, %v65_v15  ;;  %v75_v18 = vmul.f32 %v71_v12, %v71_v12  ;;  %v77_v19 = vmul.f32 %v73_v13, %v73_v13 }
  0xae   :  { %v72_v20 = vsub.f32 %v907_v2, %v68_v16  ;;  %v74_v21 = vsub.f32 %v913_v5, %v70_v17  ;;  %v79_v22 = vsel %vm53_vm0, %v75_v18, 0.0  ;;  %v85_v23 = vsel %vm53_vm0, %v77_v19, 0.0 }
  0xaf   :  { %80 = vadd.xlane.f32.xlu0 %v79_v22 }
  0xb0   :  { %v76_v24 = vmul.f32 %v72_v20, %v72_v20  ;;  %v78_v25 = vmul.f32 %v74_v21, %v74_v21 }
  0xb2   :  { %v82_v26 = vsel %vm53_vm0, %v76_v24, 0.0  ;;  %v88_v27 = vsel %vm53_vm0, %v78_v25, 0.0 }
  0xb3   :  { %86 = vadd.xlane.f32.xlu0 %v85_v23  ;;  %83 = vadd.xlane.f32.xlu1 %v82_v26 }
  0xb7   :  { %89 = vadd.xlane.f32.xlu1 %v88_v27 }
 0x138   :  { %v81_v32 = vpop.xlane.xlu0 %80 }
 0x139   :  { %v91_v33 = vmul.f32 0.03125, %v81_v32 }
 0x13b   :  { %v95_v34 = vadd.f32 1e-05, %v91_v33 }
 0x13c   :  { %v84_v35 = vpop.xlane.xlu1 %83  ;;  %v87_v36 = vpop.xlane.xlu0 %86 }
 0x13d   :  { %764 = vrsqrt.f32 %v95_v34  ;;  %v92_v37 = vmul.f32 0.03125, %v84_v35  ;;  %v93_v38 = vmul.f32 0.03125, %v87_v36 }
 0x13f   :  { %v96_v39 = vadd.f32 1e-05, %v92_v37  ;;  %v97_v40 = vadd.f32 1e-05, %v93_v38 }
 0x140   :  { %v90_v41 = vpop.xlane.xlu1 %89 }
 0x141   :  { %766 = vrsqrt.f32 %v96_v39  ;;  %v94_v42 = vmul.f32 0.03125, %v90_v41 }
 0x142   :  { %768 = vrsqrt.f32 %v97_v40 }
 0x143   :  { %v98_v43 = vadd.f32 1e-05, %v94_v42 }
 0x145   :  { %770 = vrsqrt.f32 %v98_v43 }
 0x14a   :  { %v765_v44 = vpop.eup %764 }
 0x14b   :  { %v103_v46 = vmul.f32 %v765_v44, %v71_v12 }
 0x14d   :  { %v114_v48 = vmul.f32 %v672_v45, %v103_v46 }
 0x14e   :  { %v767_v49 = vpop.eup %766 }
 0x14f   :  { %v769_v50 = vpop.eup %768  ;;  %v125_v51 = vadd.f32 %v673_v47, %v114_v48  ;;  %v104_v52 = vmul.f32 %v767_v49, %v72_v20 }
 0x150   :  { %v105_v53 = vmul.f32 %v769_v50, %v73_v13 }
 0x151   :  { %723 = vmatprep.mubr.msk.f32.mxu0 %vm53_vm0, %v125_v51  ;;  %v115_v54 = vmul.f32 %v672_v45, %v104_v52 }
 0x152   :  { %v771_v55 = vpop.eup %770  ;;  %v116_v56 = vmul.f32 %v672_v45, %v105_v53 }
 0x153   :  { %v126_v57 = vadd.f32 %v673_v47, %v115_v54  ;;  %v106_v58 = vmul.f32 %v771_v55, %v74_v21 }
 0x154   :  { %v127_v59 = vadd.f32 %v673_v47, %v116_v56 }
 0x155   :  { %724 = vmatmul.mubr.msk.f32.vlgmr.msra.gmra.mxu0 %vm53_vm0, %v126_v57  ;;  %v117_v60 = vmul.f32 %v672_v45, %v106_v58 }
 0x156   :  { %726 = vmatprep.mubr.msk.f32.mxu0 %vm53_vm0, %v127_v59 }
 0x157   :  { %v128_v61 = vadd.f32 %v673_v47, %v117_v60 }
 0x159   :  { %727 = vmatmul.mubr.msk.f32.gmra.mxu0 %vm53_vm0, %v128_v61 }
 0x215   :  { %v725_v63 = vpop.f32.mrf.mxu0 }
 0x216   :  { %v940_v3 = vadd.f32 %v725_v63, %v674_v62 }
 0x217   :  { %v218_v4 = vpop.f32.mrf.mxu0 }
 0x218   :  { %v942_v6 = vadd.f32 %v674_v62, %v218_v4  ;;  %241 = vrot.lane.b32.xlu0 %v940_v3, %s858_s7 }
 0x219   :  { %v728_v7 = vpop.f32.mrf.mxu0 }
 0x21a   :  { %239 = vrot.lane.b32.xlu1 %v942_v6, %s858_s7  ;;  %733 = vmatprep.mubr.msk.f32.mxu1 %vm53_vm0, %v942_v6  ;;  %v234_v9 = vadd.f32 %v728_v7, %v674_v62 }
 0x21b   :  { %v228_v8 = vpop.f32.mrf.mxu0 }
 0x21c   :  { %v229_v10 = vadd.f32 %v674_v62, %v228_v8 }
 0x21e   :  { %330 = vrot.lane.b32.xlu1 %v234_v9, %s858_s7  ;;  %740 = vmatprep.mubr.msk.f32.mxu0 %vm53_vm0, %v229_v10 }
 0x222   :  { %328 = vrot.lane.b32.xlu1 %v229_v10, %s858_s7 }
 0x28a   :  { %v242_v11 = vpop.permute.xlu0 %241 }
 0x28b   :  { %729 = vmatprep.subr.msk.mxu1 %vm53_vm0, %v242_v11 }
 0x28c   :  { %v240_v12 = vpop.permute.xlu1 %239  ;;  %730 = vmatpush3.xpose.msk.msra.mxu1 %vm53_vm0, %v242_v11 }
 0x28d   :  { %731 = vmatprep.subr.msk.mxu1 %vm53_vm0, %v240_v12 }
 0x290   :  { %v331_v13 = vpop.permute.xlu1 %330  ;;  %732 = vmatpush3.xpose.msk.msra.mxu1 %vm53_vm0, %v240_v12 }
 0x291   :  { %736 = vmatprep.subr.msk.mxu0 %vm53_vm0, %v331_v13 }
 0x292   :  { %737 = vmatpush3.xpose.msk.msra.mxu0 %vm53_vm0, %v331_v13 }
 0x293   :  { %734 = vmatmul.mubr.msk.f32.vlgmr.msra.gmra.mxu1 %vm53_vm0, %v940_v3 }
 0x294   :  { %v329_v14 = vpop.permute.xlu1 %328 }
 0x295   :  { %738 = vmatprep.subr.msk.mxu0 %vm53_vm0, %v329_v14 }
 0x296   :  { %739 = vmatpush3.xpose.msk.msra.mxu0 %vm53_vm0, %v329_v14 }
 0x299   :  { %741 = vmatmul.mubr.msk.f32.vlgmr.msra.gmra.mxu0 %vm53_vm0, %v234_v9 }
 0x353   :  { %v735_v15 = vpop.f32.mrf.mxu1 }
 0x354   :  { %v419_v16 = vsel %vm415_vm1, %v735_v15, -inf }
 0x355   :  { %420 = vmax.xlane.f32.xlu1 %v419_v16  ;;  %v317_v17 = vpop.f32.mrf.mxu1 }
 0x356   :  { %v416_v18 = vsel %vm415_vm1, %v317_v17, -inf }
 0x357   :  { %417 = vmax.xlane.f32.xlu0 %v416_v18 }
 0x359   :  { %v742_v19 = vpop.f32.mrf.mxu0 }
 0x35a   :  { %v425_v22 = vsel %vm415_vm1, %v742_v19, -inf }
 0x35b   :  { %v406_v20 = vpop.f32.mrf.mxu0 }
 0x35c   :  { %v422_v21 = vsel %vm415_vm1, %v406_v20, -inf }
 0x35d   :  { %423 = vmax.xlane.f32.xlu0 %v422_v21 }
 0x361   :  { %426 = vmax.xlane.f32.xlu0 %v425_v22 }
 0x3de   :  { %v421_v23 = vpop.xlane.xlu1 %420 }
 0x3df   :  { %v429_v24 = vsub.f32 %v735_v15, %v421_v23 }
 0x3e0   :  { %v418_v25 = vpop.xlane.xlu0 %417 }
 0x3e1   :  { %v434_v26 = vmul.f32 1.442695, %v429_v24  ;;  %v428_v27 = vsub.f32 %v317_v17, %v418_v25 }
 0x3e3   :  { %772 = vpow2.f32 %v434_v26  ;;  %v432_v28 = vmul.f32 1.442695, %v428_v27 }
 0x3e5   :  { %774 = vpow2.f32 %v432_v28 }
 0x3e6   :  { %v424_v29 = vpop.xlane.xlu0 %423 }
 0x3e7   :  { %v430_v30 = vsub.f32 %v406_v20, %v424_v29 }
 0x3e9   :  { %v436_v31 = vmul.f32 1.442695, %v430_v30 }
 0x3ea   :  { %v427_v32 = vpop.xlane.xlu0 %426 }
 0x3eb   :  { %776 = vpow2.f32 %v436_v31  ;;  %v431_v33 = vsub.f32 %v742_v19, %v427_v32 }
 0x3ed   :  { %v438_v34 = vmul.f32 1.442695, %v431_v33 }
 0x3ef   :  { %778 = vpow2.f32 %v438_v34 }
 0x3f0   :  { %v773_v35 = vpop.eup %772 }
 0x3f1   :  { %v443_v36 = vsel %vm415_vm1, %v773_v35, 0.0 }
 0x3f2   :  { %v775_v37 = vpop.eup %774  ;;  %444 = vadd.xlane.f32.xlu1 %v443_v36 }
 0x3f3   :  { %v440_v38 = vsel %vm415_vm1, %v775_v37, 0.0 }
 0x3f4   :  { %441 = vadd.xlane.f32.xlu0 %v440_v38 }
 0x3f8   :  { %v777_v39 = vpop.eup %776 }
 0x3f9   :  { %v446_v40 = vsel %vm415_vm1, %v777_v39, 0.0 }
 0x3fa   :  { %447 = vadd.xlane.f32.xlu0 %v446_v40 }
 0x3fc   :  { %v779_v41 = vpop.eup %778 }
 0x3fd   :  { %v449_v42 = vsel %vm415_vm1, %v779_v41, 0.0 }
 0x3fe   :  { %450 = vadd.xlane.f32.xlu1 %v449_v42 }
 0x40f   :  { %460 = vrot.lane.b32.xlu1 %v942_v6, %s859_s4 }
 0x410   :  { %462 = vrot.lane.b32.xlu0 %v940_v3, %s859_s4 }
 0x413   :  { %549 = vrot.lane.b32.xlu1 %v234_v9, %s859_s4 }
 0x417   :  { %547 = vrot.lane.b32.xlu1 %v229_v10, %s859_s4 }
 0x47b   :  { %v445_v43 = vpop.xlane.xlu1 %444 }
 0x47c   :  { %780 = vrcp.f32 %v445_v43 }
 0x47d   :  { %v442_v44 = vpop.xlane.xlu0 %441 }
 0x47e   :  { %782 = vrcp.f32 %v442_v44 }
 0x483   :  { %v448_v45 = vpop.xlane.xlu0 %447 }
 0x484   :  { %784 = vrcp.f32 %v448_v45 }
 0x487   :  { %v451_v46 = vpop.xlane.xlu1 %450  ;;  %v463_v47 = vpop.permute.xlu0 %462 }
 0x488   :  { %786 = vrcp.f32 %v451_v46  ;;  %743 = vmatprep.subr.mxu1 %v463_v47 }
 0x489   :  { %744 = vmatpush3.msra.mxu1 %v463_v47  ;;  %v781_v48 = vpop.eup %780 }
 0x48a   :  { %v455_v52 = vmul.f32 %v781_v48, %v773_v35 }
 0x48b   :  { %v783_v49 = vpop.eup %782  ;;  %v461_v50 = vpop.permute.xlu1 %460 }
 0x48c   :  { %745 = vmatprep.subr.mxu1 %v461_v50  ;;  %v453_v51 = vmul.f32 %v783_v49, %v775_v37 }
 0x48d   :  { %746 = vmatpush3.msra.mxu1 %v461_v50 }
 0x48e   :  { %747 = vmatprep.mubr.msk.f32.mxu1 %vm415_vm1, %v453_v51 }
 0x48f   :  { %v550_v53 = vpop.permute.xlu1 %549  ;;  %748 = vmatmul.mubr.msk.f32.vlgmr.msra.gmra.mxu1 %vm415_vm1, %v455_v52 }
 0x490   :  { %750 = vmatprep.subr.mxu1 %v550_v53 }
 0x491   :  { %v785_v54 = vpop.eup %784  ;;  %751 = vmatpush3.msra.mxu1 %v550_v53 }
 0x492   :  { %v457_v55 = vmul.f32 %v785_v54, %v777_v39 }
 0x493   :  { %v548_v56 = vpop.permute.xlu1 %547 }
 0x494   :  { %752 = vmatprep.subr.mxu1 %v548_v56  ;;  %754 = vmatprep.mubr.msk.f32.mxu1 %vm415_vm1, %v457_v55 }
 0x495   :  { %v787_v57 = vpop.eup %786  ;;  %753 = vmatpush3.msra.mxu1 %v548_v56 }
 0x496   :  { %v459_v58 = vmul.f32 %v787_v57, %v779_v41 }
 0x498   :  { %755 = vmatmul.mubr.msk.f32.vlgmr.msra.gmra.mxu1 %vm415_vm1, %v459_v58 }
 0x54f   :  { %v749_v59 = vpop.f32.mrf.mxu1 }
 0x550   :  { %vm635_vm2 = vcmp.ge.f32.partialorder %v749_v59, 0.0  ;;  %v639_v60 = vmul.f32 0.01, %v749_v59 }
 0x551   :  { %v538_v61 = vpop.f32.mrf.mxu1 }
 0x552   :  { %v643_v62 = vsel %vm635_vm2, %v749_v59, %v639_v60  ;;  %vm634_vm3 = vcmp.ge.f32.partialorder %v538_v61, 0.0  ;;  %v638_v63 = vmul.f32 0.01, %v538_v61 }
 0x553   :  { %v647_v3 = vadd.f32 %v643_v62, %v907_v2 }
 0x554   :  { %v642_v4 = vsel %vm634_vm3, %v538_v61, %v638_v63 }
 0x555   :  { %651 = vst.msk [vmem:[#allocation7 + $0x8] sm:$0xff] %vm53_vm0, %v647_v3  ;;  %v646_v6 = vadd.f32 %v642_v4, %v903_v0 }
 0x557   :  { %650 = vst.msk [vmem:[#allocation7] sm:$0xff] %vm53_vm0, %v646_v6 }
 0x558   :  { %v756_v7 = vpop.f32.mrf.mxu1 }
 0x559   :  { %vm637_vm4 = vcmp.ge.f32.partialorder %v756_v7, 0.0  ;;  %v641_v8 = vmul.f32 0.01, %v756_v7 }
 0x55a   :  { %v625_v9 = vpop.f32.mrf.mxu1 }
 0x55b   :  { %v645_v10 = vsel %vm637_vm4, %v756_v7, %v641_v8  ;;  %vm636_vm5 = vcmp.ge.f32.partialorder %v625_v9, 0.0  ;;  %v640_v11 = vmul.f32 0.01, %v625_v9 }
 0x55c   :  { %v649_v12 = vadd.f32 %v645_v10, %v913_v5 }
 0x55d   :  { %v644_v13 = vsel %vm636_vm5, %v625_v9, %v640_v11 }
 0x55e   :  { %653 = vst.msk [vmem:[#allocation7 + $0x18] sm:$0xff] %vm53_vm0, %v649_v12  ;;  %v648_v2 = vadd.f32 %v644_v13, %v905_v1 }
 0x560   :  { %652 = vst.msk [vmem:[#allocation7 + $0x10] sm:$0xff] %vm53_vm0, %v648_v2 }
 0x561   :  { %839 = shalt.err (!%p836_p0)
}
 0x562   :  { %665 = dma.vmem_to_hbm [thread:$0]  %s660_s9, 512, %s993_s5, [#allocation4], %s855_s21, %s855_s21, %s856_s22  }
 0x563   :  { %852 = dma.done.wait [#allocation4], 512  }
 0x564   :  { %853 = vsyncadd [#allocation4], 4294966784 }
 0x565   :  { %669 = vsyncpa [#allocation3], 1 }
 0x566   :  { %670 = vsyncpa [#allocation6], 1 }
 0x567   :  { %671 = vsyncpa [#allocation4], 1 }

</bundles_post_ra>
